<compile_context>
chip_gen: v7x
topology: tpu7x:2x2x1
jax: 0.10.0
libtpu: 0.0.40
codegen_flags: <defaults>
</compile_context>

<pallas_src>
import functools
import math

import jax
import jax.numpy as jnp
from jax.experimental import pallas as pl
from jax.experimental.pallas import tpu as pltpu

LANES = 128
VMEM_LIMIT = 32 * 1024 * 1024  # raise v5e's 16 MiB scoped default; safe on v6e/v7x


# --------------------------------------------------------------------------- #
# Kernels
# --------------------------------------------------------------------------- #
def _fused_kernel(scal_ref, x_ref, o_ref, hoyer_ref):
    """Single-block fused path: Hoyer stats + binary spike in one pass."""
    inv_thr = scal_ref[0]                       # 1 / threshold
    s = scal_ref[1]                             # x_thr_scale
    x = x_ref[...].astype(jnp.float32) * inv_thr
    c = jnp.clip(x, 0.0, 1.0)
    c = jnp.where(c >= 1.0, 0.0, c)             # clamped_input[clamped_input >= 1.0] = 0
    ssq = jnp.sum(c * c, keepdims=True)         # (1, 1)
    sabs = jnp.sum(c, keepdims=True)            # c >= 0, so |c| == c
    hoyer = ssq / sabs                          # (1, 1)
    hoyer_ref[...] = hoyer
    t = s * hoyer                               # broadcast (1,1) threshold
    out = jnp.clip(x, 0.0, 1.0)
    # Two separate where's to keep the torch masking semantics exactly
    # (including the NaN-hoyer case where neither mask fires).
    out = jnp.where(out < t, 0.0, out)
    out = jnp.where(out >= t, 1.0, out)
    o_ref[...] = out.astype(o_ref.dtype)


def _hoyer_stats_kernel(inv_thr_ref, x_ref, ssq_ref, sabs_ref, *, total_rows):
    """Per-block partial Hoyer statistics, accumulated in a vreg-shaped slab."""
    rows = x_ref.shape[0]
    x = x_ref[...].astype(jnp.float32) * inv_thr_ref[0]
    c = jnp.clip(x, 0.0, 1.0)
    c = jnp.where(c >= 1.0, 0.0, c)
    if total_rows is not None:
        # Ragged last block: rows >= total_rows are out-of-bounds garbage.
        row_ids = (jax.lax.broadcasted_iota(jnp.int32, (rows, LANES), 0)
                   + pl.program_id(0) * rows)
        c = jnp.where(row_ids < total_rows, c, 0.0)
    c3 = c.reshape(rows // 8, 8, LANES)          # regroup sublanes; no tile-crossing copy
    ssq_ref[0] = jnp.sum(c3 * c3, axis=0)        # elementwise vreg adds (VPU)
    sabs_ref[0] = jnp.sum(c3, axis=0)            # c >= 0, so |c| == c


def _spike_kernel(inv_thr_ref, thr_ref, x_ref, o_ref):
    """Binary spike: clamp then threshold against (x_thr_scale * hoyer_thr)."""
    x = x_ref[...].astype(jnp.float32) * inv_thr_ref[0]
    out = jnp.clip(x, 0.0, 1.0)
    t = thr_ref[0]
    out = jnp.where(out < t, 0.0, out)
    out = jnp.where(out >= t, 1.0, out)
    o_ref[...] = out.astype(o_ref.dtype)


# --------------------------------------------------------------------------- #
# Wrapper
# --------------------------------------------------------------------------- #
def hoyer_biact_forward(x_nchw, threshold, running_hoyer_thr, *,
                        x_thr_scale=1.0, momentum=0.1,
                        tile_rows=None, fused_max_rows=8192):
    """Training-mode forward of HoyerBiAct (spike_type='sum').

    Returns (out, new_running_hoyer_thr); `out` has the input's shape and dtype.
    """
    orig_shape = x_nchw.shape
    orig_dtype = x_nchw.dtype
    total = math.prod(orig_shape)

    # Lane-dense 2-D slab; pad only up to a lane multiple (<= 127 elements).
    M = pl.cdiv(total, LANES)
    pad = M * LANES - total
    x_flat = x_nchw.reshape(-1)
    if pad:
        x_flat = jnp.pad(x_flat, (0, pad))       # zeros contribute 0 to both sums
    x2d = x_flat.reshape(M, LANES)               # native dtype; cast happens in-kernel

    dsize = jnp.dtype(orig_dtype).itemsize
    inv_thr = jnp.reshape(1.0 / threshold.astype(jnp.float32), (1,))
    smem_scalar = pl.BlockSpec(memory_space=pltpu.SMEM)

    use_fused = (tile_rows is None) and (M <= fused_max_rows)

    if use_fused:
        # ---- Fused path: stats + spike in one VMEM-resident kernel ---------
        scal = jnp.stack([inv_thr[0], jnp.asarray(x_thr_scale, jnp.float32)])
        out2d, hoyer11 = pl.pallas_call(
            _fused_kernel,
            out_shape=(jax.ShapeDtypeStruct((M, LANES), orig_dtype),
                       jax.ShapeDtypeStruct((1, 1), jnp.float32)),
            grid_spec=pltpu.PrefetchScalarGridSpec(
                num_scalar_prefetch=0,
                grid=(1,),
                in_specs=[smem_scalar,
                          pl.BlockSpec((M, LANES), lambda i: (0, 0))],
                out_specs=(pl.BlockSpec((M, LANES), lambda i: (0, 0)),
                           pl.BlockSpec((1, 1), lambda i: (0, 0))),
            ),
            compiler_params=pltpu.CompilerParams(
                dimension_semantics=("arbitrary",),
                vmem_limit_bytes=VMEM_LIMIT),
            cost_estimate=pl.CostEstimate(
                flops=12 * M * LANES, transcendentals=0,
                bytes_accessed=2 * M * LANES * dsize),
        )(scal, x2d)
        hoyer_thr = hoyer11[0, 0]
    else:
        # ---- Tiled two-pass path -------------------------------------------
        tr = tile_rows
        if tr is None:
            cap = 8192 if dsize <= 2 else 4096   # ~2 MiB blocks
            tr = min(cap, max(8, pl.next_power_of_2(M)))
            # v7x: keep >= 2 blocks so both TensorCores stream HBM.
            while pl.cdiv(M, tr) < 2 and tr > 8:
                tr //= 2
        assert tr % 8 == 0, "tile_rows must be a multiple of 8"
        nblk = pl.cdiv(M, tr)
        ragged_rows = M if (M % tr) else None    # mask OOB rows only when needed

        # Pass 1: per-block partial Hoyer statistics (parallel over blocks).
        ssq_p, sabs_p = pl.pallas_call(
            functools.partial(_hoyer_stats_kernel, total_rows=ragged_rows),
            out_shape=(jax.ShapeDtypeStruct((nblk, 8, LANES), jnp.float32),
                       jax.ShapeDtypeStruct((nblk, 8, LANES), jnp.float32)),
            grid_spec=pltpu.PrefetchScalarGridSpec(
                num_scalar_prefetch=0,
                grid=(nblk,),
                in_specs=[smem_scalar,
                          pl.BlockSpec((tr, LANES), lambda i: (i, 0))],
                out_specs=(pl.BlockSpec((1, 8, LANES), lambda i: (i, 0, 0)),
                           pl.BlockSpec((1, 8, LANES), lambda i: (i, 0, 0))),
            ),
            compiler_params=pltpu.CompilerParams(
                dimension_semantics=("parallel",),
                vmem_limit_bytes=VMEM_LIMIT),
            cost_estimate=pl.CostEstimate(
                flops=6 * M * LANES, transcendentals=0,
                bytes_accessed=M * LANES * dsize + nblk * 2 * 8 * LANES * 4),
        )(inv_thr, x2d)

        # Tiny final reduction as JAX glue.
        hoyer_thr = jnp.sum(ssq_p) / jnp.sum(sabs_p)
        hthr_scaled = jnp.reshape(x_thr_scale * hoyer_thr, (1,)).astype(jnp.float32)

        # Pass 2: elementwise spike (native-dtype in/out).
        out2d = pl.pallas_call(
            _spike_kernel,
            out_shape=jax.ShapeDtypeStruct((M, LANES), orig_dtype),
            grid_spec=pltpu.PrefetchScalarGridSpec(
                num_scalar_prefetch=0,
                grid=(nblk,),
                in_specs=[smem_scalar, smem_scalar,
                          pl.BlockSpec((tr, LANES), lambda i: (i, 0))],
                out_specs=pl.BlockSpec((tr, LANES), lambda i: (i, 0)),
            ),
            compiler_params=pltpu.CompilerParams(
                dimension_semantics=("parallel",),
                vmem_limit_bytes=VMEM_LIMIT),
            cost_estimate=pl.CostEstimate(
                flops=6 * M * LANES, transcendentals=0,
                bytes_accessed=2 * M * LANES * dsize),
        )(inv_thr, hthr_scaled, x2d)

    # Running-stat update (scalar glue).
    new_running = momentum * hoyer_thr + (1.0 - momentum) * running_hoyer_thr

    out = out2d.reshape(-1)
    if pad:
        out = out[:total]
    return out.reshape(orig_shape), new_running


# --------------------------------------------------------------------------- #
# Pure-JAX reference & tests
# --------------------------------------------------------------------------- #
def _reference(x_nchw, threshold, running_hoyer_thr, x_thr_scale=1.0, momentum=0.1):
    x = x_nchw.astype(jnp.float32) / threshold
    c = jnp.clip(x, 0.0, 1.0)
    c = jnp.where(c >= 1.0, 0.0, c)
    hoyer = jnp.sum(c * c) / jnp.sum(jnp.abs(c))
    out = jnp.clip(x, 0.0, 1.0)
    out = jnp.where(out < x_thr_scale * hoyer, 0.0, out)
    out = jnp.where(out >= x_thr_scale * hoyer, 1.0, out)
    new_running = momentum * hoyer + (1.0 - momentum) * running_hoyer_thr
    return out.astype(x_nchw.dtype), new_running


if __name__ == "__main__":
    # Deterministic parameter init (matches module __init__ for spike_type='sum'):
    threshold = jnp.asarray(1.0, jnp.float32)          # nn.Parameter(torch.tensor(1.0))
    running_hoyer_thr = jnp.zeros((1,), jnp.float32)   # buffer, num_features == 1 for 'sum'

    def check(x, **kw):
        out, new_run = hoyer_biact_forward(x, threshold, running_hoyer_thr, **kw)
        out = jax.block_until_ready(out)
        new_run = jax.block_until_ready(new_run)
        ref_out, ref_run = _reference(x, threshold, running_hoyer_thr)
        assert out.shape == x.shape and out.dtype == x.dtype
        assert jnp.allclose(out, ref_out), "spike output mismatch"
        assert jnp.allclose(new_run, ref_run, rtol=1e-5, atol=1e-7), "running stat mismatch"

    # 1) Fused single-kernel path (small slab, total % 128 == 0).
    x = jax.random.normal(jax.random.PRNGKey(0), (2, 4, 16, 16), dtype=jnp.float32)
    check(x)

    # 2) Fused path with a lane-tail pad (total % 128 != 0).
    x_pad = jax.random.normal(jax.random.PRNGKey(2), (2, 3, 5, 7), dtype=jnp.float32)
    check(x_pad)

    # 3) Tiled two-pass path (forced), exact block division — exercises the
    #    parallel grid + partial-sum reduction used for large tensors.
    check(x, fused_max_rows=0, tile_rows=8)

    # 4) Tiled two-pass path with a ragged last block (masked tail rows).
    x_ragged = jax.random.normal(jax.random.PRNGKey(1), (2, 3, 16, 16), dtype=jnp.float32)
    check(x_ragged, fused_max_rows=0, tile_rows=8)

    # TODO(synk): eval-mode path (hoyer_thr = running buffer), 'fixed' and per-channel
    # 'cw' spike_type, the surrogate-gradient backward, and a bf16-native compute
    # path (v6e/v7x) are not implemented here; only the training 'sum' forward.
    print("KERNEL_OK")
</pallas_src>

<mosaic_0001>
module attributes {stable_mosaic.version = 11 : i64} {
  func.func @_fused_kernel(%arg0: i32, %arg1: memref<2xf32, #tpu.memory_space<smem>>, %arg2: memref<16x128xf32, #tpu.memory_space<vmem>>, %arg3: memref<16x128xf32, #tpu.memory_space<vmem>>, %arg4: memref<1x1xf32, #tpu.memory_space<vmem>>) attributes {dimension_semantics = [#tpu.dimension_semantics<arbitrary>], iteration_bounds = array<i64: 1>, scalar_prefetch = 0 : i64, scratch_operands = 0 : i64, tpu.core_type = #tpu.core_type<tc>, window_params = [{transform_indices = @transform_0, window_bounds = array<i64: 2>}, {pipeline_mode = #tpu.pipeline_mode<synchronous>, transform_indices = @transform_1, window_bounds = array<i64: 16, 128>}, {pipeline_mode = #tpu.pipeline_mode<synchronous>, transform_indices = @transform_2, window_bounds = array<i64: 16, 128>}, {pipeline_mode = #tpu.pipeline_mode<synchronous>, transform_indices = @transform_3, window_bounds = array<i64: 1, 1>}]} {
    %c0 = arith.constant 0 : index
    %0 = memref.load %arg1[%c0] : memref<2xf32, #tpu.memory_space<smem>>
    %c1 = arith.constant 1 : index
    %1 = memref.load %arg1[%c1] : memref<2xf32, #tpu.memory_space<smem>>
    %c0_0 = arith.constant 0 : index
    %c0_1 = arith.constant 0 : index
    %2 = vector.load %arg2[%c0_0, %c0_1] : memref<16x128xf32, #tpu.memory_space<vmem>>, vector<16x128xf32>
    %3 = vector.broadcast %0 : f32 to vector<16x128xf32>
    %4 = arith.mulf %2, %3 : vector<16x128xf32>
    %cst = arith.constant 0.000000e+00 : f32
    %cst_2 = arith.constant 1.000000e+00 : f32
    %5 = vector.broadcast %cst : f32 to vector<16x128xf32>
    %6 = arith.maximumf %5, %4 : vector<16x128xf32>
    %7 = vector.broadcast %cst_2 : f32 to vector<16x128xf32>
    %8 = arith.minimumf %7, %6 : vector<16x128xf32>
    %cst_3 = arith.constant 1.000000e+00 : f32
    %9 = vector.broadcast %cst_3 : f32 to vector<16x128xf32>
    %10 = arith.cmpf oge, %8, %9 : vector<16x128xf32>
    %cst_4 = arith.constant 0.000000e+00 : f32
    %11 = vector.broadcast %cst_4 : f32 to vector<16x128xf32>
    %12 = arith.select %10, %11, %8 : vector<16x128xi1>, vector<16x128xf32>
    %13 = arith.mulf %12, %12 : vector<16x128xf32>
    %14 = vector.shape_cast %13 : vector<16x128xf32> to vector<1x16x128xf32>
    %cst_5 = arith.constant dense<0.000000e+00> : vector<1xf32>
    %15 = vector.multi_reduction <add>, %14, %cst_5 [1, 2] : vector<1x16x128xf32> to vector<1xf32>
    %16 = vector.shape_cast %15 : vector<1xf32> to vector<1x1x1xf32>
    %17 = vector.extract %16[0, 0, 0] : f32 from vector<1x1x1xf32>
    %18 = vector.broadcast %17 : f32 to vector<1x1xf32>
    %19 = vector.shape_cast %12 : vector<16x128xf32> to vector<1x16x128xf32>
    %cst_6 = arith.constant dense<0.000000e+00> : vector<1xf32>
    %20 = vector.multi_reduction <add>, %19, %cst_6 [1, 2] : vector<1x16x128xf32> to vector<1xf32>
    %21 = vector.shape_cast %20 : vector<1xf32> to vector<1x1x1xf32>
    %22 = vector.extract %21[0, 0, 0] : f32 from vector<1x1x1xf32>
    %23 = vector.broadcast %22 : f32 to vector<1x1xf32>
    %24 = arith.divf %18, %23 : vector<1x1xf32>
    %c0_7 = arith.constant 0 : index
    %c0_8 = arith.constant 0 : index
    %25 = vector.load %arg4[%c0_7, %c0_8] : memref<1x1xf32, #tpu.memory_space<vmem>>, vector<1x1xf32>
    tpu.vector_store %arg4[%c0_7, %c0_8], %24 {strides = array<i32>} : memref<1x1xf32, #tpu.memory_space<vmem>>, vector<1x1xf32>,
    %26 = vector.broadcast %1 : f32 to vector<1x1xf32>
    %27 = arith.mulf %26, %24 : vector<1x1xf32>
    %cst_9 = arith.constant 0.000000e+00 : f32
    %cst_10 = arith.constant 1.000000e+00 : f32
    %28 = vector.broadcast %cst_9 : f32 to vector<16x128xf32>
    %29 = arith.maximumf %28, %4 : vector<16x128xf32>
    %30 = vector.broadcast %cst_10 : f32 to vector<16x128xf32>
    %31 = arith.minimumf %30, %29 : vector<16x128xf32>
    %32 = vector.broadcast %27 : vector<1x1xf32> to vector<16x128xf32>
    %33 = arith.cmpf olt, %31, %32 : vector<16x128xf32>
    %cst_11 = arith.constant 0.000000e+00 : f32
    %34 = vector.broadcast %cst_11 : f32 to vector<16x128xf32>
    %35 = arith.select %33, %34, %31 : vector<16x128xi1>, vector<16x128xf32>
    %36 = vector.broadcast %27 : vector<1x1xf32> to vector<16x128xf32>
    %37 = arith.cmpf oge, %35, %36 : vector<16x128xf32>
    %cst_12 = arith.constant 1.000000e+00 : f32
    %38 = vector.broadcast %cst_12 : f32 to vector<16x128xf32>
    %39 = arith.select %37, %38, %35 : vector<16x128xi1>, vector<16x128xf32>
    %c0_13 = arith.constant 0 : index
    %c0_14 = arith.constant 0 : index
    %40 = vector.load %arg3[%c0_13, %c0_14] : memref<16x128xf32, #tpu.memory_space<vmem>>, vector<16x128xf32>
    tpu.vector_store %arg3[%c0_13, %c0_14], %39 {strides = array<i32>} : memref<16x128xf32, #tpu.memory_space<vmem>>, vector<16x128xf32>,
    return
  }
  func.func @transform_0(%arg0: i32) -> i32 {
    %c0_i32 = arith.constant 0 : i32
    %c0_i32_0 = arith.constant 0 : i32
    return %c0_i32 : i32
  }
  func.func @transform_1(%arg0: i32) -> (i32, i32) {
    %c0_i32 = arith.constant 0 : i32
    %c0_i32_0 = arith.constant 0 : i32
    %c0_i32_1 = arith.constant 0 : i32
    return %c0_i32, %c0_i32_0 : i32, i32
  }
  func.func @transform_2(%arg0: i32) -> (i32, i32) {
    %c0_i32 = arith.constant 0 : i32
    %c0_i32_0 = arith.constant 0 : i32
    %c0_i32_1 = arith.constant 0 : i32
    return %c0_i32, %c0_i32_0 : i32, i32
  }
  func.func @transform_3(%arg0: i32) -> (i32, i32) {
    %c0_i32 = arith.constant 0 : i32
    %c0_i32_0 = arith.constant 0 : i32
    %c0_i32_1 = arith.constant 0 : i32
    return %c0_i32, %c0_i32_0 : i32, i32
  }
}

</mosaic_0001>

<bundles_post_ra>
// kernel: tpu_custom_call.1
= control target key start
LH: loop header
LB: loop body
LE: loop exit
PB: predicated region body
PF: predicated region fallthrough
CT: control target
= control target key end

     0   :  { %9 = vsyncpa [#allocation5], 0  ;;  %s304_s0 = inlined_call_operand.hbm [shape: f32[2], index: 0, kind: input, shape index: {}]   ;;  %s305_s1 = inlined_call_operand.hbm [shape: f32[16,128], index: 1, kind: input, shape index: {}]   ;;  %s306_s2 = inlined_call_operand.hbm [shape: f32[16,128], index: 2, kind: output, shape index: {0}]   ;;  %s307_s3 = inlined_call_operand.hbm [shape: f32[1,1], index: 3, kind: output, shape index: {1}]  }
   0x1   :  { %10 = vsyncpa [#allocation3], 0 }
   0x2   :  { %11 = vsyncpa [#allocation4], 0 }
   0x3   :  { %12 = vsyncpa [#allocation9], 0  ;;  %s140_s14 = scalar_lea.hbm %s304_s0, 16 }
   0x4   :  { %p141_p0 = scmp.ne.s32.totalorder %s304_s0, %s140_s14  ;;  %p144_p1 = scmp.lt.u32.totalorder %s140_s14, %s304_s0 }
   0x6   :  { %p146_p2 = pnand %p144_p1, %p141_p0 }
   0x8   :  { %149 = shalt.err (!%p146_p2)
}
   0x9   :  { %s224_s19 = smov [#allocation2]   ;;  %s225_s22 = smov [#allocation6]  }
   0xa   :  { %20 = dma.hbm_to_smem %s304_s0, 16, %s224_s19, [#allocation5]  }
   0xb   :  { %s26_s23 = sshll.u32 %s225_s22, 4  ;;  %s150_s26 = scalar_lea.hbm %s305_s1, 256  ;;  %s27_s23 = int_to_ptr.vmem [resolvable:$true] %s26_s23 }
   0xc   :  { %p151_p3 = scmp.ne.s32.totalorder %s305_s1, %s150_s26  ;;  %p154_p4 = scmp.lt.u32.totalorder %s150_s26, %s305_s1 }
   0xe   :  { %p156_p5 = pnand %p154_p4, %p151_p3 }
  0x10   :  { %159 = shalt.err (!%p156_p5)
}
  0x11   :  { %s160_s4 = scalar_lea.vmem %s27_s23, 256  ;;  %p165_p7 = scmp.lt.s32.totalorder %s27_s23, %s27_s23 }
  0x12   :  { %p161_p6 = scmp.ne.s32.totalorder %s27_s23, %s160_s4  ;;  %p166_p8 = scmp.lt.s32.totalorder %s160_s4, %s160_s4 }
  0x14   :  { %p167_p9 = por %p166_p8, %p165_p7 }
  0x16   :  { %p168_p10 = pnand %p167_p9, %p161_p6 }
  0x18   :  { %171 = shalt.err (!%p168_p10)
}
  0x19   :  { %s226_s0 = smov 128   ;;  %s227_s5 = smov 8  }
  0x1a   :  { %32 = dma.hbm_to_vmem [thread:$0]  %s305_s1, 256, %s27_s23, [#allocation3], %s226_s0, %s226_s0, %s227_s5  }
  0x1b   :  { %216 = dma.done.wait [#allocation5], 16  }
  0x1c   :  { %217 = vsyncadd [#allocation5], 4294967280 }
  0x1d   :  { %218 = dma.done.wait [#allocation3], 256  }
  0x1e   :  { %219 = vsyncadd [#allocation3], 4294967040 }
  0x1f   :  { %39 = sfence }
  0x20   :  { %s40_s8 = sld [smem:[#allocation2]]  ;;  %v42_v0 = vld [vmem:[#allocation6] sm:$0xff]  ;;  %v43_v1 = vld [vmem:[#allocation6 + $0x8] sm:$0xff]  ;;  %s127_s10 = sld [smem:[#allocation2 + $0x1]]  ;;  %vm81_vm2 = vcmask 0  }
  0x21   :  { %s228_s11 = smov [#allocation8]   ;;  %s229_s13 = smov [#allocation7]  }
  0x22   :  { %s113_s12 = sshll.u32 %s228_s11, 4  ;;  %s100_s14 = sshll.u32 %s229_s13, 4  ;;  %s114_s12 = int_to_ptr.vmem [resolvable:$true] %s113_s12  ;;  %s101_s14 = int_to_ptr.vmem [resolvable:$true] %s100_s14 }
  0x23   :  { %s172_s15 = scalar_lea.vmem %s114_s12, 16  ;;  %s176_s16 = scalar_lea.vmem %s114_s12, 32 }
  0x24   :  { %p173_p11 = scmp.ne.s32.totalorder %s114_s12, %s172_s15  ;;  %p177_p12 = scmp.lt.s32.totalorder %s114_s12, %s114_s12 }
  0x25   :  { %p178_p13 = scmp.lt.s32.totalorder %s176_s16, %s172_s15 }
  0x26   :  { %v44_v2 = vstv %s40_s8  ;;  %v83_v32 = vstv %s127_s10 }
  0x27   :  { %v45_v3 = vmul.f32 %v44_v2, %v42_v0  ;;  %v46_v4 = vmul.f32 %v44_v2, %v43_v1  ;;  %p179_p0 = por %p178_p13, %p177_p12 }
  0x29   :  { %v47_v5 = vmax.f32 %v45_v3, 0.0  ;;  %v48_v6 = vmax.f32 %v46_v4, 0.0  ;;  %p180_p1 = pnand %p179_p0, %p173_p11 }
  0x2b   :  { %v49_v7 = vmin.f32 %v47_v5, 1.0  ;;  %v50_v8 = vmin.f32 %v48_v6, 1.0 }
  0x2d   :  { %vm51_vm0 = vcmp.ge.f32.partialorder %v49_v7, 1.0  ;;  %vm52_vm1 = vcmp.ge.f32.partialorder %v50_v8, 1.0 }
  0x2e   :  { %v53_v9 = vsel %vm51_vm0, 0.0, %v49_v7  ;;  %v54_v10 = vsel %vm52_vm1, 0.0, %v50_v8 }
  0x2f   :  { %v55_v11 = vmul.f32 %v53_v9, %v53_v9  ;;  %v56_v12 = vmul.f32 %v54_v10, %v54_v10  ;;  %v68_v14 = vadd.f32 %v54_v10, %v53_v9 }
  0x31   :  { %v57_v13 = vadd.f32 %v56_v12, %v55_v11 }
  0x33   :  { %58 = vadd.xlane.f32.xlu0 %v57_v13 }
  0x37   :  { %69 = vadd.xlane.f32.xlu0 %v68_v14 }
  0xc0   :  { %v59_v15 = vpop.xlane.xlu0 %58 }
  0xc1   :  { %v60_v16 = vrot.slane %v59_v15, 4 }
  0xc3   :  { %v61_v17 = vadd.f32 %v60_v16, %v59_v15 }
  0xc4   :  { %v70_v18 = vpop.xlane.xlu0 %69 }
  0xc5   :  { %v62_v19 = vrot.slane %v61_v17, 2  ;;  %v71_v20 = vrot.slane %v70_v18, 4 }
  0xc7   :  { %v72_v21 = vadd.f32 %v71_v20, %v70_v18  ;;  %v63_v22 = vadd.f32 %v62_v19, %v61_v17 }
  0xc9   :  { %v73_v23 = vrot.slane %v72_v21, 2  ;;  %v64_v24 = vrot.slane %v63_v22, 1 }
  0xcb   :  { %v74_v25 = vadd.f32 %v73_v23, %v72_v21  ;;  %v65_v26 = vadd.f32 %v64_v24, %v63_v22 }
  0xcd   :  { %128 = vpush %v65_v26  ;;  %v75_v27 = vrot.slane %v74_v25, 1 }
  0xcf   :  { %v76_v28 = vadd.f32 %v75_v27, %v74_v25 }
  0xd1   :  { %130 = vpush %v76_v28 }
  0xfe   :  { %s129_s1 = spop %128 }
  0xff   :  { %v67_v31 = vstv %s129_s1 }
 0x102   :  { %s131_s9 = spop %130 }
 0x103   :  { %v78_v29 = vstv %s131_s9 }
 0x104   :  { %138 = vrcp.f32 %v78_v29 }
 0x10e   :  { %v139_v30 = vpop.eup %138 }
 0x10f   :  { %v80_v33 = vmul.f32 %v139_v30, %v67_v31 }
 0x111   :  { %v84_v34 = vmul.f32 %v83_v32, %v80_v33  ;;  %82 = vst.msk [vmem:[#allocation8] sm:$0x1] %vm81_vm2, %v80_v33 }
 0x112   :  { %183 = shalt.err (!%p180_p1)
}
 0x113   :  { %s184_s19 = scalar_lea.hbm %s307_s3, 16 }
 0x114   :  { %p185_p2 = scmp.ne.s32.totalorder %s307_s3, %s184_s19  ;;  %p188_p3 = scmp.lt.u32.totalorder %s184_s19, %s307_s3 }
 0x116   :  { %p190_p4 = pnand %p188_p3, %p185_p2 }
 0x118   :  { %193 = shalt.err (!%p190_p4)
}
 0x119   :  { %116 = dma.vmem_to_hbm [thread:$0]  %s114_s12, 16, %s307_s3, [#allocation9]   ;;  %vm85_vm3 = vcmp.lt.f32.partialorder %v49_v7, %v84_v34  ;;  %vm86_vm4 = vcmp.lt.f32.partialorder %v50_v8, %v84_v34 }
 0x11a   :  { %v87_v35 = vsel %vm85_vm3, 0.0, %v49_v7  ;;  %v88_v36 = vsel %vm86_vm4, 0.0, %v50_v8  ;;  %s194_s26 = scalar_lea.vmem %s101_s14, 256  ;;  %p199_p6 = scmp.lt.s32.totalorder %s101_s14, %s101_s14 }
 0x11b   :  { %vm89_vm5 = vcmp.ge.f32.partialorder %v87_v35, %v84_v34  ;;  %vm90_vm6 = vcmp.ge.f32.partialorder %v88_v36, %v84_v34  ;;  %p195_p5 = scmp.ne.s32.totalorder %s101_s14, %s194_s26  ;;  %p200_p7 = scmp.lt.s32.totalorder %s194_s26, %s194_s26 }
 0x11c   :  { %v91_v37 = vsel %vm89_vm5, 1.0, %v87_v35  ;;  %v92_v38 = vsel %vm90_vm6, 1.0, %v88_v36 }
 0x11d   :  { %93 = vst [vmem:[#allocation7] sm:$0xff] %v91_v37  ;;  %94 = vst [vmem:[#allocation7 + $0x8] sm:$0xff] %v92_v38  ;;  %p201_p8 = por %p200_p7, %p199_p6 }
 0x11f   :  { %p202_p9 = pnand %p201_p8, %p195_p5 }
 0x121   :  { %205 = shalt.err (!%p202_p9)
}
 0x122   :  { %s206_s28 = scalar_lea.hbm %s306_s2, 256 }
 0x123   :  { %p207_p10 = scmp.ne.s32.totalorder %s306_s2, %s206_s28  ;;  %p210_p11 = scmp.lt.u32.totalorder %s206_s28, %s306_s2 }
 0x125   :  { %p212_p12 = pnand %p210_p11, %p207_p10 }
 0x127   :  { %215 = shalt.err (!%p212_p12)
}
 0x128   :  { %106 = dma.vmem_to_hbm [thread:$0]  %s101_s14, 256, %s306_s2, [#allocation4], %s226_s0, %s226_s0, %s227_s5  }
 0x129   :  { %220 = dma.done.wait [#allocation4], 256  }
 0x12a   :  { %221 = vsyncadd [#allocation4], 4294967040 }
 0x12b   :  { %222 = dma.done.wait [#allocation9], 16  }
 0x12c   :  { %223 = vsyncadd [#allocation9], 4294967280 }
 0x12d   :  { %123 = vsyncpa [#allocation3], 1 }
 0x12e   :  { %124 = vsyncpa [#allocation4], 1 }
 0x12f   :  { %125 = vsyncpa [#allocation9], 1 }
 0x130   :  { %126 = vsyncpa [#allocation5], 1 }

</bundles_post_ra>
